<compile_context>
chip_gen: v7x
topology: tpu7x:2x2x1
jax: 0.10.0
libtpu: 0.0.40
codegen_flags: <defaults>
</compile_context>

<pallas_src>
import math

import jax
import jax.numpy as jnp
from jax import lax
from jax.experimental import pallas as pl
from jax.experimental.pallas import tpu as pltpu

_LANES = 128
_SLAB = 16          # rows per slab: multiple of 16 -> aligned for f32 and bf16 tiling


def _round_up(x, m):
    return (x + m - 1) // m * m


def _tpu_vmem_capacity_bytes():
    """Best-effort VMEM capacity query; conservative (v7x-sized) fallback."""
    try:
        info = pltpu.get_tpu_info()
        for attr in ("vmem_capacity_bytes", "vmem_size_bytes", "vmem_bytes"):
            v = getattr(info, attr, None)
            if v:
                return int(v)
    except Exception:
        pass
    return 64 << 20


def _choose_tiling(n_elem, bytes_per_logical_row):
    """Pick (num_core_splits, tile_rows, padded_rows, vmem_limit_bytes).

    bytes_per_logical_row = bytes of ONE row (128 lanes) across all pred+tgt
    inputs in their native dtypes.
    """
    vmem_cap = _tpu_vmem_capacity_bytes()
    if vmem_cap >= (96 << 20):
        # v5e / v6e: 128 MiB physical VMEM -> big tiles, raised scoped limit.
        input_budget, target_rows, vmem_limit = 48 << 20, 1024, 64 << 20
    else:
        # v7x-class (64 MiB per TensorCore) or unknown: stay conservative.
        input_budget, target_rows, vmem_limit = 20 << 20, 512, 40 << 20

    bytes_per_row = 2 * bytes_per_logical_row          # x2 for double-buffering
    cap = max(_SLAB, (input_budget // bytes_per_row) // _SLAB * _SLAB)
    target = max(_SLAB, min(target_rows, cap))

    rows = _round_up(pl.cdiv(n_elem, _LANES), _SLAB)

    if rows <= target:
        return 1, rows, rows, vmem_limit
    if rows <= 2 * target:
        tile = _round_up(rows, 2 * _SLAB) // 2
        return 2, tile, 2 * tile, vmem_limit

    # Prefer an exact divisor (no padding) with a reasonably large tile,
    # 2-way core split first (wins on v7x, neutral on v5e/v6e).
    lo = max(_SLAB, (target // 2) // _SLAB * _SLAB)
    for nc in (2, 1):
        t = target
        while t >= lo:
            if rows % (nc * t) == 0:
                return nc, t, rows, vmem_limit
            t -= _SLAB

    # Fall back to zero-padding (exact for squared-error sums).
    tile = target
    padded = _round_up(rows, 2 * tile)
    return 2, tile, padded, vmem_limit


def _make_sq_err_kernel(num_fields, tile_rows, nacc):
    """Kernel computing per-field sum((pred - tgt)^2) partials over row tiles."""
    n_groups = tile_rows // (_SLAB * nacc)
    unroll = True if n_groups <= 8 else 2

    def kernel(*refs):
        pred_refs = refs[:num_fields]                 # each (tile_rows, 128), native dtype
        tgt_refs = refs[num_fields:2 * num_fields]    # each (tile_rows, 128), native dtype
        out_ref = refs[2 * num_fields]                # (1, F, 1) f32 per-core partial sums
        acc_ref = refs[2 * num_fields + 1]            # (F, _SLAB, 128) f32 scratch

        r = pl.program_id(1)

        @pl.when(r == 0)
        def _init():
            acc_ref[...] = jnp.zeros_like(acc_ref)

        # Hot loop: slab-sliced ref reads, in-register upcast, `nacc` independent
        # accumulation chains per field -> constant vreg pressure, pure VPU work.
        for f in range(num_fields):
            p_ref = pred_refs[f]
            t_ref = tgt_refs[f]

            def body(g, carry, p_ref=p_ref, t_ref=t_ref):
                new = []
                for a in range(nacc):
                    row = pl.multiple_of(g * (_SLAB * nacc) + a * _SLAB, _SLAB)
                    d = (p_ref[pl.ds(row, _SLAB), :].astype(jnp.float32)
                         - t_ref[pl.ds(row, _SLAB), :].astype(jnp.float32))
                    new.append(carry[a] + d * d)
                return tuple(new)

            zero = jnp.zeros((_SLAB, _LANES), jnp.float32)
            partials = lax.fori_loop(0, n_groups, body, (zero,) * nacc,
                                     unroll=unroll)

            # Tree-merge the independent chains, then fold into the persistent acc.
            merged = list(partials)
            while len(merged) > 1:
                nxt = []
                for i in range(0, len(merged), 2):
                    if i + 1 < len(merged):
                        nxt.append(merged[i] + merged[i + 1])
                    else:
                        nxt.append(merged[i])
                merged = nxt
            acc_ref[f] = acc_ref[f] + merged[0]

        # Finalize: one cross-lane/sublane reduction pass per core pass.
        @pl.when(r == pl.num_programs(1) - 1)
        def _finalize():
            acc = acc_ref[...]                                   # (F, 16, 128)
            lane_sums = jnp.sum(acc, axis=2)                     # (F, 16)
            per_field = jnp.sum(lane_sums, axis=1, keepdims=True)  # (F, 1)
            out_ref[0] = per_field

    return kernel


def multi_head_loss_autotune(head_fields, head_targets, lambdas, log_sigmas):
    """Forward pass of MultiHeadLossAutoTune with per-field MSE head losses.

    head_fields / head_targets: list (per head) of list (per field) of NCHW arrays.
    Returns (total_loss, flat_head_losses) like the PyTorch module.
    """
    lambdas = jnp.asarray(lambdas)
    log_sigmas = jnp.asarray(log_sigmas)

    flat_fields = [f for head in head_fields for f in head]
    flat_targets = [t for head in head_targets for t in head]
    num_fields = len(flat_fields)
    assert num_fields == lambdas.shape[0] == log_sigmas.shape[0]

    n_elem = math.prod(flat_fields[0].shape)
    # TODO(synk): real openpifpaf heads have heterogeneous per-field losses/shapes;
    # supporting those needs per-field element counts and per-field row padding.
    assert all(math.prod(f.shape) == n_elem for f in flat_fields)
    assert all(math.prod(t.shape) == n_elem for t in flat_targets)

    bytes_per_logical_row = sum(
        _LANES * jnp.dtype(x.dtype).itemsize for x in flat_fields + flat_targets)
    nc, tile_rows, padded_rows, vmem_limit = _choose_tiling(
        n_elem, bytes_per_logical_row)
    blocks_per_core = padded_rows // (nc * tile_rows)

    def _prep(x):
        # Free reshape for contiguous data; zero-pad only when needed (padding
        # BOTH operands with zeros contributes exactly 0 to the squared error).
        flat = jnp.ravel(x)
        pad = padded_rows * _LANES - flat.shape[0]
        if pad:
            flat = jnp.pad(flat, (0, pad))
        return jnp.reshape(flat, (padded_rows, _LANES))

    # Native dtype is passed straight through (bf16 halves HBM traffic);
    # the f32 upcast happens inside the kernel.
    preds = [_prep(x) for x in flat_fields]
    tgts = [_prep(x) for x in flat_targets]

    slabs = tile_rows // _SLAB
    nacc = 4 if slabs % 4 == 0 else (2 if slabs % 2 == 0 else 1)
    kernel = _make_sq_err_kernel(num_fields, tile_rows, nacc)

    field_spec = pl.BlockSpec((tile_rows, _LANES),
                              lambda c, r: (c * blocks_per_core + r, 0))
    out_spec = pl.BlockSpec((1, num_fields, 1), lambda c, r: (c, 0, 0))

    partial_sums = pl.pallas_call(
        kernel,
        out_shape=jax.ShapeDtypeStruct((nc, num_fields, 1), jnp.float32),
        grid=(nc, blocks_per_core),
        in_specs=[field_spec] * (2 * num_fields),
        out_specs=out_spec,
        scratch_shapes=[pltpu.VMEM((num_fields, _SLAB, _LANES), jnp.float32)],
        compiler_params=pltpu.CompilerParams(
            dimension_semantics=("parallel", "arbitrary"),
            vmem_limit_bytes=vmem_limit),
    )(*preds, *tgts)

    # Tiny O(F) epilogue: merge per-core partials, normalize to MSE, and apply
    # the Kendall-Gal-Cipolla uncertainty weighting.
    per_field_sum = jnp.sum(partial_sums[:, :, 0], axis=0)          # (F,)
    flat_head_losses = per_field_sum * (1.0 / float(n_elem))        # per-field MSE
    lam = lambdas.astype(jnp.float32)
    # TODO(synk): PyTorch stores log_sigmas as float64; the TPU path uses float32.
    log_sigma = log_sigmas.astype(jnp.float32)
    # lam * l / (2 * exp(log_sigma)^2) == lam * l * 0.5 * exp(-2*log_sigma)
    total_loss = jnp.sum(lam * flat_head_losses * (0.5 * jnp.exp(-2.0 * log_sigma))
                         + lam * log_sigma)
    # NOTE: task_sparsity_weight == 0.0 in the module, so the sparsity branch
    # is a no-op and is intentionally not implemented.
    return total_loss, flat_head_losses


def _reference(head_fields, head_targets, lambdas, log_sigmas):
    ff = [f for head in head_fields for f in head]
    ft = [t for head in head_targets for t in head]
    losses = jnp.stack([
        jnp.mean((f.astype(jnp.float32) - t.astype(jnp.float32)) ** 2)
        for f, t in zip(ff, ft)])
    lam = jnp.asarray(lambdas, jnp.float32)
    ls = jnp.asarray(log_sigmas, jnp.float32)
    total = jnp.sum(lam * losses / (2.0 * jnp.exp(ls) ** 2) + lam * ls)
    return total, losses


if __name__ == "__main__":
    mhl = jax.jit(multi_head_loss_autotune)

    def make_case(seed, n_heads, fields_per_head, shape, dtype,
                  lambdas, log_sigmas):
        n_fields = n_heads * fields_per_head
        keys = jax.random.split(jax.random.PRNGKey(seed), 2 * n_fields)
        k = iter(keys)
        hf = [[jax.random.normal(next(k), shape, dtype=jnp.float32).astype(dtype)
               for _ in range(fields_per_head)] for _ in range(n_heads)]
        ht = [[jax.random.normal(next(k), shape, dtype=jnp.float32).astype(dtype)
               for _ in range(fields_per_head)] for _ in range(n_heads)]
        return hf, ht, jnp.asarray(lambdas, jnp.float32), jnp.asarray(log_sigmas, jnp.float32)

    def check(hf, ht, lam, ls):
        total, losses = mhl(hf, ht, lam, ls)
        jax.block_until_ready((total, losses))
        ref_total, ref_losses = _reference(hf, ht, lam, ls)
        assert jnp.allclose(losses, ref_losses, rtol=1e-4, atol=1e-4), (losses, ref_losses)
        assert jnp.allclose(total, ref_total, rtol=1e-4, atol=1e-4), (total, ref_total)

    # Case 1: module-default parameters (lambdas=1, log_sigmas=0), small NCHW f32.
    hf, ht, lam, ls = make_case(
        0, n_heads=2, fields_per_head=2, shape=(2, 4, 16, 16), dtype=jnp.float32,
        lambdas=[1.0] * 4, log_sigmas=[0.0] * 4)
    check(hf, ht, lam, ls)

    # Case 2: bf16 fields with an awkward element count (exercises native-dtype
    # passthrough + zero-padding path) and non-trivial lambdas / log_sigmas.
    hf, ht, lam, ls = make_case(
        1, n_heads=1, fields_per_head=2, shape=(2, 3, 25, 24), dtype=jnp.bfloat16,
        lambdas=[1.0, 0.5], log_sigmas=[0.1, -0.2])
    check(hf, ht, lam, ls)

    # Case 3: larger fields -> multi-block grid + 2-way core split + partial merge.
    hf, ht, lam, ls = make_case(
        2, n_heads=1, fields_per_head=3, shape=(2, 8, 96, 128), dtype=jnp.float32,
        lambdas=[1.0, 0.5, 2.0], log_sigmas=[0.1, -0.2, 0.3])
    check(hf, ht, lam, ls)

    print("KERNEL_OK")
</pallas_src>

<mosaic_0001>
module attributes {stable_mosaic.version = 11 : i64} {
  func.func @kernel(%arg0: i32, %arg1: i32, %arg2: memref<16x128xf32, #tpu.memory_space<vmem>>, %arg3: memref<16x128xf32, #tpu.memory_space<vmem>>, %arg4: memref<16x128xf32, #tpu.memory_space<vmem>>, %arg5: memref<16x128xf32, #tpu.memory_space<vmem>>, %arg6: memref<16x128xf32, #tpu.memory_space<vmem>>, %arg7: memref<16x128xf32, #tpu.memory_space<vmem>>, %arg8: memref<16x128xf32, #tpu.memory_space<vmem>>, %arg9: memref<16x128xf32, #tpu.memory_space<vmem>>, %arg10: memref<1x4x1xf32, #tpu.memory_space<vmem>>, %arg11: memref<4x16x128xf32, #tpu.memory_space<vmem>>) attributes {dimension_semantics = [#tpu.dimension_semantics<parallel>, #tpu.dimension_semantics<arbitrary>], iteration_bounds = array<i64: 1, 1>, scalar_prefetch = 0 : i64, scratch_operands = 1 : i64, tpu.core_type = #tpu.core_type<tc>, window_params = [{transform_indices = @transform_0, window_bounds = array<i64: 16, 128>}, {transform_indices = @transform_1, window_bounds = array<i64: 16, 128>}, {transform_indices = @transform_2, window_bounds = array<i64: 16, 128>}, {transform_indices = @transform_3, window_bounds = array<i64: 16, 128>}, {transform_indices = @transform_4, window_bounds = array<i64: 16, 128>}, {transform_indices = @transform_5, window_bounds = array<i64: 16, 128>}, {transform_indices = @transform_6, window_bounds = array<i64: 16, 128>}, {transform_indices = @transform_7, window_bounds = array<i64: 16, 128>}, {transform_indices = @transform_8, window_bounds = array<i64: 1, 4, 1>}]} {
    %c0_i32 = arith.constant 0 : i32
    %0 = arith.cmpi eq, %arg1, %c0_i32 : i32
    %1 = arith.extui %0 : i1 to i32
    %c0_i32_0 = arith.constant 0 : i32
    %2 = arith.cmpi ne, %1, %c0_i32_0 : i32
    scf.if %2 {
      %cst_48 = arith.constant 0.000000e+00 : f32
      %74 = vector.broadcast %cst_48 : f32 to vector<4x16x128xf32>
      %c0_49 = arith.constant 0 : index
      %c0_50 = arith.constant 0 : index
      %c0_51 = arith.constant 0 : index
      %75 = vector.load %arg11[%c0_49, %c0_50, %c0_51] : memref<4x16x128xf32, #tpu.memory_space<vmem>>, vector<4x16x128xf32>
      tpu.vector_store %arg11[%c0_49, %c0_50, %c0_51], %74 {strides = array<i32>} : memref<4x16x128xf32, #tpu.memory_space<vmem>>, vector<4x16x128xf32>,
    } else {
    }
    %cst = arith.constant 0.000000e+00 : f32
    %3 = vector.broadcast %cst : f32 to vector<16x128xf32>
    %c0_i32_1 = arith.constant 0 : i32
    %c16_i32 = arith.constant 16 : i32
    %4 = arith.muli %c0_i32_1, %c16_i32 : i32
    %c0_i32_2 = arith.constant 0 : i32
    %5 = arith.addi %4, %c0_i32_2 : i32
    %6 = tpu.assume_multiple %5, 16 : i32
    %7 = arith.index_cast %6 : i32 to index
    %c0 = arith.constant 0 : index
    %8 = vector.load %arg2[%7, %c0] : memref<16x128xf32, #tpu.memory_space<vmem>>, vector<16x128xf32>
    %9 = arith.index_cast %6 : i32 to index
    %c0_3 = arith.constant 0 : index
    %10 = vector.load %arg6[%9, %c0_3] : memref<16x128xf32, #tpu.memory_space<vmem>>, vector<16x128xf32>
    %11 = arith.subf %8, %10 : vector<16x128xf32>
    %12 = arith.mulf %11, %11 : vector<16x128xf32>
    %13 = arith.addf %3, %12 : vector<16x128xf32>
    %c1_i32 = arith.constant 1 : i32
    %c0_4 = arith.constant 0 : index
    %c0_5 = arith.constant 0 : index
    %c0_6 = arith.constant 0 : index
    %14 = vector.load %arg11[%c0_4, %c0_5, %c0_6] : memref<4x16x128xf32, #tpu.memory_space<vmem>>, vector<1x16x128xf32>
    %15 = vector.shape_cast %14 : vector<1x16x128xf32> to vector<16x128xf32>
    %16 = arith.addf %15, %13 : vector<16x128xf32>
    %c0_7 = arith.constant 0 : index
    %c0_8 = arith.constant 0 : index
    %c0_9 = arith.constant 0 : index
    %17 = vector.load %arg11[%c0_7, %c0_8, %c0_9] : memref<4x16x128xf32, #tpu.memory_space<vmem>>, vector<1x16x128xf32>
    %18 = vector.shape_cast %17 : vector<1x16x128xf32> to vector<16x128xf32>
    %19 = vector.shape_cast %16 : vector<16x128xf32> to vector<1x16x128xf32>
    tpu.vector_store %arg11[%c0_7, %c0_8, %c0_9], %19 {strides = array<i32>} : memref<4x16x128xf32, #tpu.memory_space<vmem>>, vector<1x16x128xf32>,
    %cst_10 = arith.constant 0.000000e+00 : f32
    %20 = vector.broadcast %cst_10 : f32 to vector<16x128xf32>
    %c0_i32_11 = arith.constant 0 : i32
    %c16_i32_12 = arith.constant 16 : i32
    %21 = arith.muli %c0_i32_11, %c16_i32_12 : i32
    %c0_i32_13 = arith.constant 0 : i32
    %22 = arith.addi %21, %c0_i32_13 : i32
    %23 = tpu.assume_multiple %22, 16 : i32
    %24 = arith.index_cast %23 : i32 to index
    %c0_14 = arith.constant 0 : index
    %25 = vector.load %arg3[%24, %c0_14] : memref<16x128xf32, #tpu.memory_space<vmem>>, vector<16x128xf32>
    %26 = arith.index_cast %23 : i32 to index
    %c0_15 = arith.constant 0 : index
    %27 = vector.load %arg7[%26, %c0_15] : memref<16x128xf32, #tpu.memory_space<vmem>>, vector<16x128xf32>
    %28 = arith.subf %25, %27 : vector<16x128xf32>
    %29 = arith.mulf %28, %28 : vector<16x128xf32>
    %30 = arith.addf %20, %29 : vector<16x128xf32>
    %c1_i32_16 = arith.constant 1 : i32
    %c1 = arith.constant 1 : index
    %c0_17 = arith.constant 0 : index
    %c0_18 = arith.constant 0 : index
    %31 = vector.load %arg11[%c1, %c0_17, %c0_18] : memref<4x16x128xf32, #tpu.memory_space<vmem>>, vector<1x16x128xf32>
    %32 = vector.shape_cast %31 : vector<1x16x128xf32> to vector<16x128xf32>
    %33 = arith.addf %32, %30 : vector<16x128xf32>
    %c1_19 = arith.constant 1 : index
    %c0_20 = arith.constant 0 : index
    %c0_21 = arith.constant 0 : index
    %34 = vector.load %arg11[%c1_19, %c0_20, %c0_21] : memref<4x16x128xf32, #tpu.memory_space<vmem>>, vector<1x16x128xf32>
    %35 = vector.shape_cast %34 : vector<1x16x128xf32> to vector<16x128xf32>
    %36 = vector.shape_cast %33 : vector<16x128xf32> to vector<1x16x128xf32>
    tpu.vector_store %arg11[%c1_19, %c0_20, %c0_21], %36 {strides = array<i32>} : memref<4x16x128xf32, #tpu.memory_space<vmem>>, vector<1x16x128xf32>,
    %cst_22 = arith.constant 0.000000e+00 : f32
    %37 = vector.broadcast %cst_22 : f32 to vector<16x128xf32>
    %c0_i32_23 = arith.constant 0 : i32
    %c16_i32_24 = arith.constant 16 : i32
    %38 = arith.muli %c0_i32_23, %c16_i32_24 : i32
    %c0_i32_25 = arith.constant 0 : i32
    %39 = arith.addi %38, %c0_i32_25 : i32
    %40 = tpu.assume_multiple %39, 16 : i32
    %41 = arith.index_cast %40 : i32 to index
    %c0_26 = arith.constant 0 : index
    %42 = vector.load %arg4[%41, %c0_26] : memref<16x128xf32, #tpu.memory_space<vmem>>, vector<16x128xf32>
    %43 = arith.index_cast %40 : i32 to index
    %c0_27 = arith.constant 0 : index
    %44 = vector.load %arg8[%43, %c0_27] : memref<16x128xf32, #tpu.memory_space<vmem>>, vector<16x128xf32>
    %45 = arith.subf %42, %44 : vector<16x128xf32>
    %46 = arith.mulf %45, %45 : vector<16x128xf32>
    %47 = arith.addf %37, %46 : vector<16x128xf32>
    %c1_i32_28 = arith.constant 1 : i32
    %c2 = arith.constant 2 : index
    %c0_29 = arith.constant 0 : index
    %c0_30 = arith.constant 0 : index
    %48 = vector.load %arg11[%c2, %c0_29, %c0_30] : memref<4x16x128xf32, #tpu.memory_space<vmem>>, vector<1x16x128xf32>
    %49 = vector.shape_cast %48 : vector<1x16x128xf32> to vector<16x128xf32>
    %50 = arith.addf %49, %47 : vector<16x128xf32>
    %c2_31 = arith.constant 2 : index
    %c0_32 = arith.constant 0 : index
    %c0_33 = arith.constant 0 : index
    %51 = vector.load %arg11[%c2_31, %c0_32, %c0_33] : memref<4x16x128xf32, #tpu.memory_space<vmem>>, vector<1x16x128xf32>
    %52 = vector.shape_cast %51 : vector<1x16x128xf32> to vector<16x128xf32>
    %53 = vector.shape_cast %50 : vector<16x128xf32> to vector<1x16x128xf32>
    tpu.vector_store %arg11[%c2_31, %c0_32, %c0_33], %53 {strides = array<i32>} : memref<4x16x128xf32, #tpu.memory_space<vmem>>, vector<1x16x128xf32>,
    %cst_34 = arith.constant 0.000000e+00 : f32
    %54 = vector.broadcast %cst_34 : f32 to vector<16x128xf32>
    %c0_i32_35 = arith.constant 0 : i32
    %c16_i32_36 = arith.constant 16 : i32
    %55 = arith.muli %c0_i32_35, %c16_i32_36 : i32
    %c0_i32_37 = arith.constant 0 : i32
    %56 = arith.addi %55, %c0_i32_37 : i32
    %57 = tpu.assume_multiple %56, 16 : i32
    %58 = arith.index_cast %57 : i32 to index
    %c0_38 = arith.constant 0 : index
    %59 = vector.load %arg5[%58, %c0_38] : memref<16x128xf32, #tpu.memory_space<vmem>>, vector<16x128xf32>
    %60 = arith.index_cast %57 : i32 to index
    %c0_39 = arith.constant 0 : index
    %61 = vector.load %arg9[%60, %c0_39] : memref<16x128xf32, #tpu.memory_space<vmem>>, vector<16x128xf32>
    %62 = arith.subf %59, %61 : vector<16x128xf32>
    %63 = arith.mulf %62, %62 : vector<16x128xf32>
    %64 = arith.addf %54, %63 : vector<16x128xf32>
    %c1_i32_40 = arith.constant 1 : i32
    %c3 = arith.constant 3 : index
    %c0_41 = arith.constant 0 : index
    %c0_42 = arith.constant 0 : index
    %65 = vector.load %arg11[%c3, %c0_41, %c0_42] : memref<4x16x128xf32, #tpu.memory_space<vmem>>, vector<1x16x128xf32>
    %66 = vector.shape_cast %65 : vector<1x16x128xf32> to vector<16x128xf32>
    %67 = arith.addf %66, %64 : vector<16x128xf32>
    %c3_43 = arith.constant 3 : index
    %c0_44 = arith.constant 0 : index
    %c0_45 = arith.constant 0 : index
    %68 = vector.load %arg11[%c3_43, %c0_44, %c0_45] : memref<4x16x128xf32, #tpu.memory_space<vmem>>, vector<1x16x128xf32>
    %69 = vector.shape_cast %68 : vector<1x16x128xf32> to vector<16x128xf32>
    %70 = vector.shape_cast %67 : vector<16x128xf32> to vector<1x16x128xf32>
    tpu.vector_store %arg11[%c3_43, %c0_44, %c0_45], %70 {strides = array<i32>} : memref<4x16x128xf32, #tpu.memory_space<vmem>>, vector<1x16x128xf32>,
    %c0_i32_46 = arith.constant 0 : i32
    %71 = arith.cmpi eq, %arg1, %c0_i32_46 : i32
    %72 = arith.extui %71 : i1 to i32
    %c0_i32_47 = arith.constant 0 : i32
    %73 = arith.cmpi ne, %72, %c0_i32_47 : i32
    scf.if %73 {
      %c0_48 = arith.constant 0 : index
      %c0_49 = arith.constant 0 : index
      %c0_50 = arith.constant 0 : index
      %74 = vector.load %arg11[%c0_48, %c0_49, %c0_50] : memref<4x16x128xf32, #tpu.memory_space<vmem>>, vector<4x16x128xf32>
      %cst_51 = arith.constant dense<0.000000e+00> : vector<4x16xf32>
      %75 = vector.multi_reduction <add>, %74, %cst_51 [2] : vector<4x16x128xf32> to vector<4x16xf32>
      %cst_52 = arith.constant dense<0.000000e+00> : vector<4xf32>
      %76 = vector.multi_reduction <add>, %75, %cst_52 [1] : vector<4x16xf32> to vector<4xf32>
      %77 = vector.shape_cast %76 : vector<4xf32> to vector<4x1xf32>
      %c0_53 = arith.constant 0 : index
      %c0_54 = arith.constant 0 : index
      %c0_55 = arith.constant 0 : index
      %78 = vector.load %arg10[%c0_53, %c0_54, %c0_55] : memref<1x4x1xf32, #tpu.memory_space<vmem>>, vector<1x4x1xf32>
      %79 = vector.shape_cast %78 : vector<1x4x1xf32> to vector<4x1xf32>
      %80 = vector.shape_cast %77 : vector<4x1xf32> to vector<1x4x1xf32>
      tpu.vector_store %arg10[%c0_53, %c0_54, %c0_55], %80 {strides = array<i32>} : memref<1x4x1xf32, #tpu.memory_space<vmem>>, vector<1x4x1xf32>,
    } else {
    }
    return
  }
  func.func @transform_0(%arg0: i32, %arg1: i32) -> (i32, i32) {
    %c1_i32 = arith.constant 1 : i32
    %0 = arith.muli %arg0, %c1_i32 : i32
    %1 = arith.addi %0, %arg1 : i32
    %c0_i32 = arith.constant 0 : i32
    %c0_i32_0 = arith.constant 0 : i32
    return %1, %c0_i32 : i32, i32
  }
  func.func @transform_1(%arg0: i32, %arg1: i32) -> (i32, i32) {
    %c1_i32 = arith.constant 1 : i32
    %0 = arith.muli %arg0, %c1_i32 : i32
    %1 = arith.addi %0, %arg1 : i32
    %c0_i32 = arith.constant 0 : i32
    %c0_i32_0 = arith.constant 0 : i32
    return %1, %c0_i32 : i32, i32
  }
  func.func @transform_2(%arg0: i32, %arg1: i32) -> (i32, i32) {
    %c1_i32 = arith.constant 1 : i32
    %0 = arith.muli %arg0, %c1_i32 : i32
    %1 = arith.addi %0, %arg1 : i32
    %c0_i32 = arith.constant 0 : i32
    %c0_i32_0 = arith.constant 0 : i32
    return %1, %c0_i32 : i32, i32
  }
  func.func @transform_3(%arg0: i32, %arg1: i32) -> (i32, i32) {
    %c1_i32 = arith.constant 1 : i32
    %0 = arith.muli %arg0, %c1_i32 : i32
    %1 = arith.addi %0, %arg1 : i32
    %c0_i32 = arith.constant 0 : i32
    %c0_i32_0 = arith.constant 0 : i32
    return %1, %c0_i32 : i32, i32
  }
  func.func @transform_4(%arg0: i32, %arg1: i32) -> (i32, i32) {
    %c1_i32 = arith.constant 1 : i32
    %0 = arith.muli %arg0, %c1_i32 : i32
    %1 = arith.addi %0, %arg1 : i32
    %c0_i32 = arith.constant 0 : i32
    %c0_i32_0 = arith.constant 0 : i32
    return %1, %c0_i32 : i32, i32
  }
  func.func @transform_5(%arg0: i32, %arg1: i32) -> (i32, i32) {
    %c1_i32 = arith.constant 1 : i32
    %0 = arith.muli %arg0, %c1_i32 : i32
    %1 = arith.addi %0, %arg1 : i32
    %c0_i32 = arith.constant 0 : i32
    %c0_i32_0 = arith.constant 0 : i32
    return %1, %c0_i32 : i32, i32
  }
  func.func @transform_6(%arg0: i32, %arg1: i32) -> (i32, i32) {
    %c1_i32 = arith.constant 1 : i32
    %0 = arith.muli %arg0, %c1_i32 : i32
    %1 = arith.addi %0, %arg1 : i32
    %c0_i32 = arith.constant 0 : i32
    %c0_i32_0 = arith.constant 0 : i32
    return %1, %c0_i32 : i32, i32
  }
  func.func @transform_7(%arg0: i32, %arg1: i32) -> (i32, i32) {
    %c1_i32 = arith.constant 1 : i32
    %0 = arith.muli %arg0, %c1_i32 : i32
    %1 = arith.addi %0, %arg1 : i32
    %c0_i32 = arith.constant 0 : i32
    %c0_i32_0 = arith.constant 0 : i32
    return %1, %c0_i32 : i32, i32
  }
  func.func @transform_8(%arg0: i32, %arg1: i32) -> (i32, i32, i32) {
    %c0_i32 = arith.constant 0 : i32
    %c0_i32_0 = arith.constant 0 : i32
    %c0_i32_1 = arith.constant 0 : i32
    return %arg0, %c0_i32, %c0_i32_0 : i32, i32, i32
  }
}

</mosaic_0001>

<bundles_post_ra>
// kernel: multi_head_loss_autotune.1
= control target key start
LH: loop header
LB: loop body
LE: loop exit
PB: predicated region body
PF: predicated region fallthrough
CT: control target
= control target key end

     0   :  { %v319_v32 = vlaneseq  ;;  %vm330_vm0 = vcmask 130112   ;;  %vm359_vm1 = vcmask 1041409   ;;  %vm361_vm2 = vcmask 1042434   ;;  %s524_s1 = inlined_call_operand.vmem [shape: f32[16,128], index: 1, kind: input, shape index: {}]   ;;  %s525_s5 = inlined_call_operand.vmem [shape: f32[16,128], index: 5, kind: input, shape index: {}]   ;;  %s526_s0 = inlined_call_operand.vmem [shape: f32[16,128], index: 0, kind: input, shape index: {}]   ;;  %s527_s4 = inlined_call_operand.vmem [shape: f32[16,128], index: 4, kind: input, shape index: {}]   ;;  %s528_s2 = inlined_call_operand.vmem [shape: f32[16,128], index: 2, kind: input, shape index: {}]   ;;  %s529_s6 = inlined_call_operand.vmem [shape: f32[16,128], index: 6, kind: input, shape index: {}]   ;;  %s530_s3 = inlined_call_operand.vmem [shape: f32[16,128], index: 3, kind: input, shape index: {}]   ;;  %s531_s7 = inlined_call_operand.vmem [shape: f32[16,128], index: 7, kind: input, shape index: {}]   ;;  %s532_s8 = inlined_call_operand.vmem [shape: f32[1,4,1], index: 8, kind: output, shape index: {}]  }
   0x1   :  { %v233_v0 = vld [vmem:[%s524_s1] sm:$0xff]  ;;  %v234_v5 = vld [vmem:[%s524_s1 + $0x8] sm:$0xff]  ;;  %vm363_vm3 = vcmask 1043459   ;;  %vm366_vm4 = vcmask 125952   ;;  %vm370_vm5 = vcmask 3072  }
   0x2   :  { %v235_v1 = vld [vmem:[%s525_s5] sm:$0xff]  ;;  %v236_v6 = vld [vmem:[%s525_s5 + $0x8] sm:$0xff]  ;;  %v320_v33 = vand.u32 127, %v319_v32  ;;  %v322_v37 = vshrl.u32 %v319_v32, 7 }
   0x3   :  { %v217_v2 = vld [vmem:[%s526_s0] sm:$0xff]  ;;  %v237_v3 = vsub.f32 %v233_v0, %v235_v1  ;;  %v238_v8 = vsub.f32 %v234_v5, %v236_v6  ;;  %v218_v9 = vld [vmem:[%s526_s0 + $0x8] sm:$0xff] }
   0x4   :  { %v219_v4 = vld [vmem:[%s527_s4] sm:$0xff]  ;;  %v220_v10 = vld [vmem:[%s527_s4 + $0x8] sm:$0xff]  ;;  %v325_v35 = vadd.s32 4294967288, %v320_v33  ;;  %v323_v41 = vsub.s32 %v320_v33, %v322_v37 }
   0x5   :  { %v221_v7 = vsub.f32 %v217_v2, %v219_v4  ;;  %v251_v11 = vld [vmem:[%s528_s2 + $0x8] sm:$0xff]  ;;  %v239_v12 = vmul.f32 %v237_v3, %v237_v3  ;;  %v222_v13 = vsub.f32 %v218_v9, %v220_v10  ;;  %v250_v15 = vld [vmem:[%s528_s2] sm:$0xff]  ;;  %v240_v18 = vmul.f32 %v238_v8, %v238_v8 }
   0x6   :  { %v253_v14 = vld [vmem:[%s529_s6 + $0x8] sm:$0xff]  ;;  %v252_v16 = vld [vmem:[%s529_s6] sm:$0xff]  ;;  %v328_v38 = vsub.s32 %v325_v35, %v322_v37 }
   0x7   :  { %v223_v17 = vmul.f32 %v221_v7, %v221_v7  ;;  %299 = vadd.xlane.f32.xlu1 %v239_v12  ;;  %v255_v19 = vsub.f32 %v251_v11, %v253_v14  ;;  %v224_v20 = vmul.f32 %v222_v13, %v222_v13  ;;  %v254_v21 = vsub.f32 %v250_v15, %v252_v16  ;;  %v268_v22 = vld [vmem:[%s530_s3 + $0x8] sm:$0xff]  ;;  %v267_v24 = vld [vmem:[%s530_s3] sm:$0xff] }
   0x8   :  { %v270_v23 = vld [vmem:[%s531_s7 + $0x8] sm:$0xff]  ;;  %v269_v25 = vld [vmem:[%s531_s7] sm:$0xff] }
   0x9   :  { %295 = vadd.xlane.f32.xlu0 %v223_v17  ;;  %v257_v26 = vmul.f32 %v255_v19, %v255_v19  ;;  %v272_v27 = vsub.f32 %v268_v22, %v270_v23  ;;  %v256_v28 = vmul.f32 %v254_v21, %v254_v21  ;;  %v271_v29 = vsub.f32 %v267_v24, %v269_v25 }
   0xb   :  { %301 = vadd.xlane.f32.xlu1 %v240_v18  ;;  %v274_v30 = vmul.f32 %v272_v27, %v272_v27  ;;  %v273_v31 = vmul.f32 %v271_v29, %v271_v29 }
   0xd   :  { %297 = vadd.xlane.f32.xlu0 %v224_v20 }
   0xf   :  { %305 = vadd.xlane.f32.xlu1 %v257_v26 }
  0x11   :  { %303 = vadd.xlane.f32.xlu0 %v256_v28 }
  0x13   :  { %309 = vadd.xlane.f32.xlu1 %v274_v30 }
  0x15   :  { %307 = vadd.xlane.f32.xlu0 %v273_v31 }
  0x94   :  { %v300_v34 = vpop.xlane.xlu1 %299 }
  0x95   :  { %v335_v47 = vrot.slane %v300_v34, %v323_v41 }
  0x96   :  { %v296_v36 = vpop.xlane.xlu0 %295 }
  0x97   :  { %v324_v48 = vrot.slane %v296_v36, %v323_v41 }
  0x98   :  { %v302_v39 = vpop.xlane.xlu1 %301 }
  0x99   :  { %v339_v42 = vrot.slane %v302_v39, %v328_v38 }
  0x9a   :  { %v298_v40 = vpop.xlane.xlu0 %297 }
  0x9b   :  { %v329_v43 = vrot.slane %v298_v40, %v328_v38  ;;  %v340_v50 = vsel %vm330_vm0, %v339_v42, %v335_v47 }
  0x9c   :  { %v306_v44 = vpop.xlane.xlu1 %305 }
  0x9d   :  { %v348_v45 = vrot.slane %v306_v44, %v328_v38  ;;  %v331_v51 = vsel %vm330_vm0, %v329_v43, %v324_v48 }
  0x9e   :  { %v304_v46 = vpop.xlane.xlu0 %303  ;;  %v360_v57 = vsel %vm359_vm1, %v340_v50, %v331_v51 }
  0x9f   :  { %v344_v49 = vrot.slane %v304_v46, %v323_v41 }
  0xa0   :  { %v310_v52 = vpop.xlane.xlu1 %309 }
  0xa1   :  { %v349_v53 = vsel %vm330_vm0, %v348_v45, %v344_v49  ;;  %v357_v54 = vrot.slane %v310_v52, %v328_v38 }
  0xa2   :  { %v308_v55 = vpop.xlane.xlu0 %307  ;;  %v362_v59 = vsel %vm361_vm2, %v349_v53, %v360_v57 }
  0xa3   :  { %v353_v56 = vrot.slane %v308_v55, %v323_v41 }
  0xa5   :  { %v358_v58 = vsel %vm330_vm0, %v357_v54, %v353_v56 }
  0xa6   :  { %v364_v60 = vsel %vm363_vm3, %v358_v58, %v362_v59 }
  0xa7   :  { %v367_v61 = vsel %vm366_vm4, %v364_v60, 0.0 }
  0xa8   :  { %368 = vadd.xlane.f32.xlu0 %v367_v61 }
 0x135   :  { %v369_v62 = vpop.xlane.xlu0 %368 }
 0x136   :  { %371 = vst.msk [vmem:[%s532_s8] sm:$0xf] %vm370_vm5, %v369_v62 }

</bundles_post_ra>
